<compile_context>
chip_gen: v7x
topology: tpu7x:2x2x1
jax: 0.10.0
libtpu: 0.0.40
codegen_flags: <defaults>
</compile_context>

<pallas_src>
import functools

import jax
import jax.numpy as jnp
from jax.experimental import pallas as pl
from jax.experimental.pallas import tpu as pltpu


def policy_net_kernel(x_ref, w1_ref, w2_ref, out_ref):
    # fc1 + ReLU (bias already folded into w1 via the ones feature column).
    h = jnp.maximum(
        jnp.dot(x_ref[...], w1_ref[...], preferred_element_type=jnp.float32),
        0.0,
    )
    # fc2 (bias folded into last row of w2; pad lanes carry -1e30 bias).
    logits = jnp.dot(h, w2_ref[...], preferred_element_type=jnp.float32)

    # Numerically stable softmax over the full 128-lane tile.  Pad lanes hold
    # ~-1e30, so exp underflows to exactly 0 there and the denominator only
    # sums the real output lanes.
    m = jnp.max(logits, axis=-1, keepdims=True)
    e = jnp.exp(logits - m)
    denom = jnp.sum(e, axis=-1, keepdims=True)
    out_ref[...] = (e * pl.reciprocal(denom, approx=True)).astype(out_ref.dtype)


@functools.partial(jax.jit, static_argnames=())
def policy_network_forward(x, w1, b1, w2, b2):
    """x: (B, In); w1: (In, H); b1: (H,); w2: (H, O); b2: (O,)."""
    B, In = x.shape
    H = w1.shape[1]
    O = w2.shape[1]
    SUB, LANE = 8, 128
    B_pad = ((B + SUB - 1) // SUB) * SUB
    O_pad = ((O + LANE - 1) // LANE) * LANE

    # x_aug: (B_pad, In+1).  Pad rows are zero; last column is the literal-1
    # feature that folds b1 (layer 1) and, after ReLU(1)=1, b2 (layer 2).
    x_aug = jnp.zeros((B_pad, In + 1), jnp.float32)
    x_aug = x_aug.at[:B, :In].set(x.astype(jnp.float32))
    x_aug = x_aug.at[:, In].set(1.0)

    # w1_aug: (In+1, H+1).  Last row = b1; last column passes the ones feature
    # through unchanged (relu(1) = 1).
    w1_aug = jnp.zeros((In + 1, H + 1), jnp.float32)
    w1_aug = w1_aug.at[:In, :H].set(w1)
    w1_aug = w1_aug.at[In, :H].set(b1)
    w1_aug = w1_aug.at[In, H].set(1.0)

    # w2_aug: (H+1, O_pad).  Last row = b2 on real lanes, -1e30 on pad lanes
    # so the softmax ignores them; columns O..O_pad-1 have zero weights.
    w2_aug = jnp.zeros((H + 1, O_pad), jnp.float32)
    w2_aug = w2_aug.at[:H, :O].set(w2)
    w2_aug = w2_aug.at[H, :O].set(b2)
    w2_aug = w2_aug.at[H, O:].set(-1e30)

    out_pad = pl.pallas_call(
        policy_net_kernel,
        out_shape=jax.ShapeDtypeStruct((B_pad, O_pad), jnp.float32),
        in_specs=[
            pl.BlockSpec(memory_space=pltpu.MemorySpace.VMEM),
            pl.BlockSpec(memory_space=pltpu.MemorySpace.VMEM),
            pl.BlockSpec(memory_space=pltpu.MemorySpace.VMEM),
        ],
        out_specs=pl.BlockSpec(memory_space=pltpu.MemorySpace.VMEM),
    )(x_aug, w1_aug, w2_aug)

    return out_pad[:B, :O]


def init_params(key, input_size, hidden_size, output_size):
    # Mimic nn.Linear default init: U(-1/sqrt(fan_in), 1/sqrt(fan_in)).
    k1, k2, k3, k4 = jax.random.split(key, 4)
    bound1 = 1.0 / jnp.sqrt(input_size)
    bound2 = 1.0 / jnp.sqrt(hidden_size)
    w1 = jax.random.uniform(k1, (input_size, hidden_size), jnp.float32, -bound1, bound1)
    b1 = jax.random.uniform(k2, (hidden_size,), jnp.float32, -bound1, bound1)
    w2 = jax.random.uniform(k3, (hidden_size, output_size), jnp.float32, -bound2, bound2)
    b2 = jax.random.uniform(k4, (output_size,), jnp.float32, -bound2, bound2)
    return w1, b1, w2, b2


if __name__ == "__main__":
    input_size, hidden_size, output_size = 16, 32, 4
    batch = 2

    key = jax.random.PRNGKey(0)
    kx, kp = jax.random.split(key)
    x = jax.random.normal(kx, (batch, input_size), jnp.float32)
    w1, b1, w2, b2 = init_params(kp, input_size, hidden_size, output_size)

    out = jax.block_until_ready(policy_network_forward(x, w1, b1, w2, b2))

    # Pure-JAX reference (PyTorch forward semantics).
    h_ref = jnp.maximum(x @ w1 + b1, 0.0)
    ref = jax.nn.softmax(h_ref @ w2 + b2, axis=-1)

    assert out.shape == (batch, output_size)
    # Slightly loose tolerance to accommodate the EUP approximate reciprocal.
    assert jnp.allclose(out, ref, atol=5e-3, rtol=5e-3), float(jnp.abs(out - ref).max())
    assert jnp.allclose(jnp.sum(out, axis=-1), 1.0, atol=5e-3)
    assert bool(jnp.all(out >= 0.0))

    print("KERNEL_OK")
</pallas_src>

<mosaic_0001>
module attributes {stable_mosaic.version = 11 : i64} {
  func.func @policy_net_kernel(%arg0: memref<8x17xf32, #tpu.memory_space<vmem>>, %arg1: memref<17x33xf32, #tpu.memory_space<vmem>>, %arg2: memref<33x128xf32, #tpu.memory_space<vmem>>, %arg3: memref<8x128xf32, #tpu.memory_space<vmem>>) attributes {dimension_semantics = [], scalar_prefetch = 0 : i64, scratch_operands = 0 : i64, tpu.core_type = #tpu.core_type<tc>} {
    %c0 = arith.constant 0 : index
    %c0_0 = arith.constant 0 : index
    %0 = vector.load %arg0[%c0, %c0_0] : memref<8x17xf32, #tpu.memory_space<vmem>>, vector<8x17xf32>
    %c0_1 = arith.constant 0 : index
    %c0_2 = arith.constant 0 : index
    %1 = vector.load %arg1[%c0_1, %c0_2] : memref<17x33xf32, #tpu.memory_space<vmem>>, vector<17x33xf32>
    %cst = arith.constant dense<0.000000e+00> : vector<8x33xf32>
    %2 = tpu.matmul %0, %1, %cst {dimension_numbers = #tpu.dot_dimension_numbers<[1], [0], [0], [1], [0, 0, 1, 1], [], []>} : vector<8x17xf32>, vector<17x33xf32>, vector<8x33xf32> -> vector<8x33xf32>
    %cst_3 = arith.constant 0.000000e+00 : f32
    %3 = vector.broadcast %cst_3 : f32 to vector<8x33xf32>
    %4 = arith.maximumf %2, %3 : vector<8x33xf32>
    %c0_4 = arith.constant 0 : index
    %c0_5 = arith.constant 0 : index
    %5 = vector.load %arg2[%c0_4, %c0_5] : memref<33x128xf32, #tpu.memory_space<vmem>>, vector<33x128xf32>
    %cst_6 = arith.constant dense<0.000000e+00> : vector<8x128xf32>
    %6 = tpu.matmul %4, %5, %cst_6 {dimension_numbers = #tpu.dot_dimension_numbers<[1], [0], [0], [1], [0, 0, 1, 1], [], []>} : vector<8x33xf32>, vector<33x128xf32>, vector<8x128xf32> -> vector<8x128xf32>
    %cst_7 = arith.constant dense<0xFF800000> : vector<8xf32>
    %7 = vector.multi_reduction <maximumf>, %6, %cst_7 [1] : vector<8x128xf32> to vector<8xf32>
    %8 = vector.shape_cast %7 : vector<8xf32> to vector<8x1xf32>
    %9 = vector.broadcast %8 : vector<8x1xf32> to vector<8x128xf32>
    %10 = arith.subf %6, %9 : vector<8x128xf32>
    %11 = math.exp %10 : vector<8x128xf32>
    %cst_8 = arith.constant dense<0.000000e+00> : vector<8xf32>
    %12 = vector.multi_reduction <add>, %11, %cst_8 [1] : vector<8x128xf32> to vector<8xf32>
    %13 = vector.shape_cast %12 : vector<8xf32> to vector<8x1xf32>
    %14 = tpu.reciprocal %13 {approx = true} : vector<8x1xf32> -> vector<8x1xf32>
    %15 = vector.broadcast %14 : vector<8x1xf32> to vector<8x128xf32>
    %16 = arith.mulf %11, %15 : vector<8x128xf32>
    %c0_9 = arith.constant 0 : index
    %c0_10 = arith.constant 0 : index
    %17 = vector.load %arg3[%c0_9, %c0_10] : memref<8x128xf32, #tpu.memory_space<vmem>>, vector<8x128xf32>
    tpu.vector_store %arg3[%c0_9, %c0_10], %16 {strides = array<i32>} : memref<8x128xf32, #tpu.memory_space<vmem>>, vector<8x128xf32>,
    return
  }
}

</mosaic_0001>

<bundles_post_ra>
// kernel: policy_network_forward.1
= control target key start
LH: loop header
LB: loop body
LE: loop exit
PB: predicated region body
PF: predicated region fallthrough
CT: control target
= control target key end

     0   :  { %v245_v0 = vmov 0.0|0.0   ;;  %vm246_vm0 = vmmov 0   ;;  %v247_v3 = vmov 0.0   ;;  %vm22_vm1 = vcmask 1040384   ;;  %s298_s1 = inlined_call_operand.vmem [shape: f32[17,33], index: 1, kind: input, shape index: {}]   ;;  %s299_s2 = inlined_call_operand.vmem [shape: f32[33,128], index: 2, kind: input, shape index: {}]   ;;  %s300_s0 = inlined_call_operand.vmem [shape: f32[8,17], index: 0, kind: input, shape index: {}]   ;;  %s301_s3 = inlined_call_operand.vmem [shape: f32[8,128], index: 3, kind: output, shape index: {}]  }
   0x1   :  { %229 = vmatprep.subr.bf16.mxu0 %v245_v0  ;;  %v15_v1 = vld [vmem:[%s298_s1] sm:$0xff]  ;;  %v16_v2 = vld [vmem:[%s298_s1 + $0x8] sm:$0xff]  ;;  %213 = vmatprep.mubr.msk.f32.mxu0 %vm246_vm0, %v247_v3  ;;  %v99_v8 = vld [vmem:[%s299_s2 + $0x10] sm:$0xff]  ;;  %vm18_vm2 = vcmask 138240   ;;  %vm102_vm3 = vcmask 269312  }
   0x2   :  { %v230_v4 = vpack.c.bf16 %v16_v2, %v15_v1  ;;  %232 = vmatprep.subr.bf16.mxu1 %v245_v0  ;;  %v97_v5 = vld [vmem:[%s299_s2] sm:$0xff]  ;;  %v98_v6 = vld [vmem:[%s299_s2 + $0x8] sm:$0xff]  ;;  %226 = vmatprep.mubr.msk.f32.mxu1 %vm246_vm0, %v247_v3  ;;  %v100_v9 = vld [vmem:[%s299_s2 + $0x18] sm:$0xff] }
   0x3   :  { %v233_v7 = vpack.c.bf16 %v98_v6, %v97_v5  ;;  %v17_v10 = vld [vmem:[%s298_s1 + $0x10] sm:$0x1]  ;;  %v236_v11 = vpack.c.bf16 %v100_v9, %v99_v8  ;;  %v14_v12 = vld [vmem:[%s300_s0] sm:$0xff] }
   0x4   :  { %231 = vmatpush3.bf16.msra.mxu0 %v230_v4  ;;  %v101_v13 = vld [vmem:[%s299_s2 + $0x20] sm:$0x1] }
   0x5   :  { %211 = vmatprep.subr.mxu0 %v247_v3  ;;  %234 = vmatpush3.bf16.msra.mxu1 %v233_v7 }
   0x6   :  { %235 = vmatprep.subr.bf16.mxu1 %v245_v0 }
   0x8   :  { %212 = vmatpush3.msk.msra.mxu0 %vm22_vm1, %v17_v10 }
   0x9   :  { %214 = vmatmul.mubr.msk.f32.vlgmr.msra.gmra.mrb[0].mxu0 %vm18_vm2, %v14_v12  ;;  %237 = vmatpush3.bf16.msra.mxu1 %v236_v11 }
   0xa   :  { %224 = vmatprep.subr.mxu1 %v247_v3 }
   0xd   :  { %225 = vmatpush3.msk.msra.mxu1 %vm22_vm1, %v101_v13 }
  0xdc   :  { %v92_v14 = vpop.f32.mrb[0].mxu0 }
  0xdd   :  { %v96_v15 = vmax.f32 %v92_v14, 0.0  ;;  %v215_v16 = vpop.f32.mrb[1].mxu0 }
  0xdf   :  { %227 = vmatmul.mubr.msk.f32.vlgmr.msra.gmra.mrb[0].mxu1 %vm102_vm3, %v96_v15 }
 0x1b2   :  { %v175_v17 = vpop.f32.mrb[0].mxu1 }
 0x1b3   :  { %179 = vmax.xlane.f32.xlu0 %v175_v17  ;;  %v228_v18 = vpop.f32.mrb[1].mxu1 }
 0x240   :  { %v180_v19 = vpop.xlane.xlu0 %179 }
 0x241   :  { %v181_v20 = vsub.f32 %v175_v17, %v180_v19 }
 0x243   :  { %v182_v21 = vmul.f32 1.442695, %v181_v20 }
 0x245   :  { %241 = vpow2.f32 %v182_v21 }
 0x24f   :  { %v242_v22 = vpop.eup %241 }
 0x250   :  { %184 = vadd.xlane.f32.xlu0 %v242_v22 }
 0x2dd   :  { %v185_v23 = vpop.xlane.xlu0 %184 }
 0x2de   :  { %243 = vrcp.f32 %v185_v23 }
 0x2e8   :  { %v244_v24 = vpop.eup %243 }
 0x2e9   :  { %v187_v25 = vmul.f32 %v244_v24, %v242_v22 }
 0x2eb   :  { %188 = vst [vmem:[%s301_s3] sm:$0xff] %v187_v25 }

</bundles_post_ra>
